<compile_context>
chip_gen: v5e
topology: v5e:2x2
jax: 0.10.0
libtpu: 0.0.40
codegen_flags: <defaults>
</compile_context>

<pallas_src>
import jax
import jax.numpy as jnp
from jax.experimental import pallas as pl
from jax.experimental.pallas import tpu as pltpu


def _round_up(x: int, m: int) -> int:
    return (x + m - 1) // m * m


def _round_down(x: int, m: int) -> int:
    return (x // m) * m


def _make_readout_kernel(n_hidden: int, sum_in_kernel: bool, compute_dtype):
    """Kernel refs: x, (w_0,b_0), ..., (w_out,b_out), out, h_scratch."""

    def kernel(*refs):
        x_ref = refs[0]
        out_ref = refs[-2]
        h_ref = refs[-1]
        params = refs[1:-2]
        j = pl.program_id(1)  # output-column tile index

        # Hidden stack runs once per batch tile; result cached in VMEM scratch.
        @pl.when(j == 0)
        def _():
            if sum_in_kernel:
                h = jnp.sum(x_ref[...].astype(jnp.float32), axis=1)   # (TB, D0)
            else:
                h = x_ref[...]                                        # (TB, S*D0)
            for i in range(n_hidden):
                w = params[2 * i][...]
                b = params[2 * i + 1][...]
                h = jnp.dot(h.astype(compute_dtype), w,
                            preferred_element_type=jnp.float32)
                h = jnp.maximum(h + b.astype(jnp.float32), 0.0)
            h_ref[...] = h.astype(jnp.float32)

        # Output layer for this column tile.
        w_o = params[2 * n_hidden][...]
        b_o = params[2 * n_hidden + 1][...]
        acc = jnp.dot(h_ref[...].astype(compute_dtype), w_o,
                      preferred_element_type=jnp.float32)
        out_ref[...] = (acc + b_o.astype(jnp.float32)).astype(out_ref.dtype)

    return kernel


def readout_forward(x, hidden_params, output_params, *,
                    tb_max: int = 1024, tn_max: int = 512,
                    vmem_limit_bytes: int | None = None):
    """Readout forward pass as a single Pallas kernel (batch x out-col grid).

    Args:
      x: (B, S, D0) input, float32 or bfloat16.
      hidden_params: list of (W, b), W:(in, out), b:(1, out).
      output_params: (W_out, b_out), W_out:(in, out), b_out:(1, out).
    Returns:
      (B, output_size) float32.
    """
    B, S, D0 = x.shape
    x_itemsize = jnp.dtype(x.dtype).itemsize
    compute_dtype = jnp.bfloat16 if x.dtype == jnp.bfloat16 else jnp.float32
    c_itemsize = jnp.dtype(compute_dtype).itemsize

    # ---- generation-aware VMEM budget (v7x: 64 MiB/core, v5e/v6e: 128 MiB) --
    if vmem_limit_bytes is None:
        try:
            vmem_cap = int(pltpu.get_tpu_info().vmem_capacity_bytes)
        except Exception:
            vmem_cap = 64 * 1024 * 1024            # conservative (v7x per-core)
        vmem_limit_bytes = min(int(vmem_cap * 0.8), 112 * 1024 * 1024)
    vmem_limit_bytes = int(vmem_limit_bytes)

    weights = [w for (w, _) in hidden_params] + [output_params[0]]
    biases = [b.reshape(1, -1) for (_, b) in hidden_params] + \
             [output_params[1].reshape(1, -1)]
    n_hidden = len(hidden_params)
    out_size = int(weights[-1].shape[1])

    # ---- decide sum strategy: fold into W1 only if the tiled weight is cheap -
    tiled_w1_bytes = S * int(weights[0].shape[0]) * int(weights[0].shape[1]) * c_itemsize
    use_fold = (n_hidden > 0) and (tiled_w1_bytes <= vmem_limit_bytes // 3)
    # TODO(synk): also prefer the in-kernel sum when S*D1 pushes the first
    # layer compute-bound on v5e's weaker f32 MXU path.
    if use_fold:
        weights[0] = jnp.tile(weights[0], (S, 1))          # (S*D0, D1)

    # ---- dtypes: native bf16 MXU when x is bf16; biases stay f32 ------------
    weights = [w.astype(compute_dtype) for w in weights]
    biases = [b.astype(jnp.float32) for b in biases]

    # ---- lane-dense, blocked output columns ---------------------------------
    tn = min(tn_max, _round_up(out_size, 128))
    out_pad = _round_up(out_size, tn)
    if out_pad != out_size:
        weights[-1] = jnp.pad(weights[-1], ((0, 0), (0, out_pad - out_size)))
        biases[-1] = jnp.pad(biases[-1], ((0, 0), (0, out_pad - out_size)))
    n_tiles_n = out_pad // tn
    h_width = int(weights[-1].shape[0])                    # input width of output layer

    # ---- parameter BlockSpecs + resident-VMEM accounting ---------------------
    def _const_spec(shape):
        idx = lambda i, j: (0, 0)
        try:
            # Constant-index inputs don't need two pipeline buffers.
            return pl.BlockSpec(shape, idx, pipeline_mode=pl.Buffered(1)), 1
        except (TypeError, AttributeError):
            return pl.BlockSpec(shape, idx), 2

    param_specs = []
    resident_bytes = 0
    for li, (w, b) in enumerate(zip(weights, biases)):
        if li < n_hidden:
            sw, nb_w = _const_spec(w.shape)
            sb, nb_b = _const_spec(b.shape)
            resident_bytes += (nb_w * int(w.size) * w.dtype.itemsize
                               + nb_b * int(b.size) * b.dtype.itemsize)
        else:  # output layer: blocked over columns, streamed (double-buffered)
            sw = pl.BlockSpec((h_width, tn), lambda i, j: (0, j))
            sb = pl.BlockSpec((1, tn), lambda i, j: (0, j))
            resident_bytes += 2 * (h_width * tn * w.dtype.itemsize
                                   + tn * b.dtype.itemsize)
        param_specs += [sw, sb]

    # ---- batch-tile size against the *remaining* VMEM ------------------------
    if use_fold:
        x_row_bytes = _round_up(S * D0, 128) * x_itemsize
    else:
        x_row_bytes = S * _round_up(D0, 128) * x_itemsize
    out_row_bytes = tn * 4
    h_row_bytes = _round_up(h_width, 128) * 4
    hidden_out_widths = [int(w.shape[1]) for w in weights[:-1]]
    inter_row_bytes = 8 * max([_round_up(d, 128) for d in hidden_out_widths] or [0])
    per_row = (2 * x_row_bytes + 2 * out_row_bytes + h_row_bytes + inter_row_bytes)

    margin = 2 * 1024 * 1024
    remaining = vmem_limit_bytes - resident_bytes - margin
    if remaining < per_row * 8:
        raise ValueError(
            f"Readout parameters ({resident_bytes / 2**20:.1f} MiB resident) leave no "
            f"room for an 8-row batch tile under vmem_limit_bytes="
            f"{vmem_limit_bytes / 2**20:.1f} MiB; reduce layer sizes or S.")

    tb = min(tb_max, _round_down(remaining // per_row, 8))
    if B >= 16:
        # At least two batch tiles so v7x's second TensorCore gets work.
        tb = min(tb, max(8, _round_down(_round_up(B, 8) // 2, 8)))
    if B < 8:
        tb = B                                   # full-dim block, no padding at all
    else:
        tb = max(8, min(tb, _round_down(B, 8)))  # ragged tail handled by Pallas
    grid_b = pl.cdiv(B, tb)

    # ---- x / out specs (no jnp.pad of x: ragged tail writes are masked) ------
    if use_fold:
        x_in = x.reshape(B, S * D0)
        x_spec = pl.BlockSpec((tb, S * D0), lambda i, j: (i, 0))
    else:
        x_in = x
        x_spec = pl.BlockSpec((tb, S, D0), lambda i, j: (i, 0, 0))
    out_spec = pl.BlockSpec((tb, tn), lambda i, j: (i, j))

    # ---- advisory cost estimate (mem-bound custom call) -----------------------
    flops = 2 * B * sum(int(w.shape[0]) * int(w.shape[1]) for w in weights)
    bytes_accessed = (int(x.size) * x_itemsize
                      + sum(int(w.size) * w.dtype.itemsize for w in weights)
                      + sum(int(b.size) * b.dtype.itemsize for b in biases)
                      + B * out_pad * 4)

    flat_params = [p for pair in zip(weights, biases) for p in pair]

    out = pl.pallas_call(
        _make_readout_kernel(n_hidden, sum_in_kernel=not use_fold,
                             compute_dtype=compute_dtype),
        out_shape=jax.ShapeDtypeStruct((B, out_pad), jnp.float32),
        grid=(grid_b, n_tiles_n),
        in_specs=[x_spec] + param_specs,
        out_specs=out_spec,
        scratch_shapes=[pltpu.VMEM((tb, h_width), jnp.float32)],
        compiler_params=pltpu.CompilerParams(
            dimension_semantics=("parallel", "arbitrary"),
            vmem_limit_bytes=vmem_limit_bytes,
        ),
        cost_estimate=pl.CostEstimate(
            flops=int(flops), transcendentals=0,
            bytes_accessed=int(bytes_accessed)),
    )(x_in, *flat_params)

    if out_pad != out_size:
        out = out[:, :out_size]
    return out


# ----------------------------- init & reference ------------------------------

def _xavier_uniform(key, fan_in, fan_out):
    # Matches torch.nn.init.xavier_uniform_ (gain=1). Stored as (in, out).
    bound = (6.0 / (fan_in + fan_out)) ** 0.5
    return jax.random.uniform(key, (fan_in, fan_out), jnp.float32, -bound, bound)


def _linear_bias_init(key, fan_in, fan_out):
    # PyTorch nn.Linear default bias init: U(-1/sqrt(fan_in), 1/sqrt(fan_in)).
    bound = 1.0 / (fan_in ** 0.5)
    return jax.random.uniform(key, (1, fan_out), jnp.float32, -bound, bound)


def init_readout_params(key, linear_size, output_size):
    hidden_params = []
    for in_s, out_s in zip(linear_size[:-1], linear_size[1:]):
        key, kw, kb = jax.random.split(key, 3)
        hidden_params.append((_xavier_uniform(kw, in_s, out_s),
                              _linear_bias_init(kb, in_s, out_s)))
    key, kw, kb = jax.random.split(key, 3)
    output_params = (_xavier_uniform(kw, linear_size[-1], output_size),
                     _linear_bias_init(kb, linear_size[-1], output_size))
    return hidden_params, output_params


def readout_reference(x, hidden_params, output_params):
    h = jnp.sum(x, axis=1)
    for (w, b) in hidden_params:
        h = jax.nn.relu(h @ w + b)
    w_o, b_o = output_params
    return h @ w_o + b_o


if __name__ == "__main__":
    # Small, module-consistent shapes: Readout(linear_size=[32, 64, 48], output_size=16)
    B, S = 2, 8
    linear_size = [32, 64, 48]
    output_size = 16

    key = jax.random.PRNGKey(0)
    key, kx = jax.random.split(key)
    x = jax.random.normal(kx, (B, S, linear_size[0]), jnp.float32)

    hidden_params, output_params = init_readout_params(key, linear_size, output_size)

    out = readout_forward(x, hidden_params, output_params)
    out = jax.block_until_ready(out)

    ref = readout_reference(x, hidden_params, output_params)
    assert out.shape == (B, output_size)
    assert jnp.allclose(out, ref, atol=1e-4, rtol=1e-4), "mismatch vs reference"

    print("KERNEL_OK")
</pallas_src>

<mosaic_0001>
module attributes {stable_mosaic.version = 11 : i64} {
  func.func @kernel(%arg0: i32, %arg1: i32, %arg2: memref<2x256xf32, #tpu.memory_space<vmem>>, %arg3: memref<256x64xf32, #tpu.memory_space<vmem>>, %arg4: memref<1x64xf32, #tpu.memory_space<vmem>>, %arg5: memref<64x48xf32, #tpu.memory_space<vmem>>, %arg6: memref<1x48xf32, #tpu.memory_space<vmem>>, %arg7: memref<48x128xf32, #tpu.memory_space<vmem>>, %arg8: memref<1x128xf32, #tpu.memory_space<vmem>>, %arg9: memref<2x128xf32, #tpu.memory_space<vmem>>, %arg10: memref<2x48xf32, #tpu.memory_space<vmem>>) attributes {dimension_semantics = [#tpu.dimension_semantics<parallel>, #tpu.dimension_semantics<arbitrary>], iteration_bounds = array<i64: 1, 1>, scalar_prefetch = 0 : i64, scratch_operands = 1 : i64, tpu.core_type = #tpu.core_type<tc>, window_params = [{transform_indices = @transform_0, window_bounds = array<i64: 2, 256>}, {pipeline_mode = #tpu.pipeline_mode<synchronous>, transform_indices = @transform_1, window_bounds = array<i64: 256, 64>}, {pipeline_mode = #tpu.pipeline_mode<synchronous>, transform_indices = @transform_2, window_bounds = array<i64: 1, 64>}, {pipeline_mode = #tpu.pipeline_mode<synchronous>, transform_indices = @transform_3, window_bounds = array<i64: 64, 48>}, {pipeline_mode = #tpu.pipeline_mode<synchronous>, transform_indices = @transform_4, window_bounds = array<i64: 1, 48>}, {transform_indices = @transform_5, window_bounds = array<i64: 48, 128>}, {transform_indices = @transform_6, window_bounds = array<i64: 1, 128>}, {transform_indices = @transform_7, window_bounds = array<i64: 2, 128>}]} {
    %c0_i32 = arith.constant 0 : i32
    %0 = arith.cmpi eq, %arg1, %c0_i32 : i32
    %1 = arith.extui %0 : i1 to i32
    %c0_i32_0 = arith.constant 0 : i32
    %2 = arith.cmpi ne, %1, %c0_i32_0 : i32
    scf.if %2 {
      %c0_8 = arith.constant 0 : index
      %c0_9 = arith.constant 0 : index
      %10 = vector.load %arg2[%c0_8, %c0_9] : memref<2x256xf32, #tpu.memory_space<vmem>>, vector<2x256xf32>
      %c0_10 = arith.constant 0 : index
      %c0_11 = arith.constant 0 : index
      %11 = vector.load %arg3[%c0_10, %c0_11] : memref<256x64xf32, #tpu.memory_space<vmem>>, vector<256x64xf32>
      %c0_12 = arith.constant 0 : index
      %c0_13 = arith.constant 0 : index
      %12 = vector.load %arg4[%c0_12, %c0_13] : memref<1x64xf32, #tpu.memory_space<vmem>>, vector<1x64xf32>
      %cst_14 = arith.constant dense<0.000000e+00> : vector<2x64xf32>
      %13 = tpu.matmul %10, %11, %cst_14 {dimension_numbers = #tpu.dot_dimension_numbers<[1], [0], [0], [1], [0, 0, 1, 1], [], []>} : vector<2x256xf32>, vector<256x64xf32>, vector<2x64xf32> -> vector<2x64xf32>
      %14 = vector.broadcast %12 : vector<1x64xf32> to vector<2x64xf32>
      %15 = arith.addf %13, %14 : vector<2x64xf32>
      %cst_15 = arith.constant 0.000000e+00 : f32
      %16 = vector.broadcast %cst_15 : f32 to vector<2x64xf32>
      %17 = arith.maximumf %15, %16 : vector<2x64xf32>
      %c0_16 = arith.constant 0 : index
      %c0_17 = arith.constant 0 : index
      %18 = vector.load %arg5[%c0_16, %c0_17] : memref<64x48xf32, #tpu.memory_space<vmem>>, vector<64x48xf32>
      %c0_18 = arith.constant 0 : index
      %c0_19 = arith.constant 0 : index
      %19 = vector.load %arg6[%c0_18, %c0_19] : memref<1x48xf32, #tpu.memory_space<vmem>>, vector<1x48xf32>
      %cst_20 = arith.constant dense<0.000000e+00> : vector<2x48xf32>
      %20 = tpu.matmul %17, %18, %cst_20 {dimension_numbers = #tpu.dot_dimension_numbers<[1], [0], [0], [1], [0, 0, 1, 1], [], []>} : vector<2x64xf32>, vector<64x48xf32>, vector<2x48xf32> -> vector<2x48xf32>
      %21 = vector.broadcast %19 : vector<1x48xf32> to vector<2x48xf32>
      %22 = arith.addf %20, %21 : vector<2x48xf32>
      %cst_21 = arith.constant 0.000000e+00 : f32
      %23 = vector.broadcast %cst_21 : f32 to vector<2x48xf32>
      %24 = arith.maximumf %22, %23 : vector<2x48xf32>
      %c0_22 = arith.constant 0 : index
      %c0_23 = arith.constant 0 : index
      %25 = vector.load %arg10[%c0_22, %c0_23] : memref<2x48xf32, #tpu.memory_space<vmem>>, vector<2x48xf32>
      tpu.vector_store %arg10[%c0_22, %c0_23], %24 {strides = array<i32>} : memref<2x48xf32, #tpu.memory_space<vmem>>, vector<2x48xf32>,
    } else {
    }
    %c0 = arith.constant 0 : index
    %c0_1 = arith.constant 0 : index
    %3 = vector.load %arg7[%c0, %c0_1] : memref<48x128xf32, #tpu.memory_space<vmem>>, vector<48x128xf32>
    %c0_2 = arith.constant 0 : index
    %c0_3 = arith.constant 0 : index
    %4 = vector.load %arg8[%c0_2, %c0_3] : memref<1x128xf32, #tpu.memory_space<vmem>>, vector<1x128xf32>
    %c0_4 = arith.constant 0 : index
    %c0_5 = arith.constant 0 : index
    %5 = vector.load %arg10[%c0_4, %c0_5] : memref<2x48xf32, #tpu.memory_space<vmem>>, vector<2x48xf32>
    %cst = arith.constant dense<0.000000e+00> : vector<2x128xf32>
    %6 = tpu.matmul %5, %3, %cst {dimension_numbers = #tpu.dot_dimension_numbers<[1], [0], [0], [1], [0, 0, 1, 1], [], []>} : vector<2x48xf32>, vector<48x128xf32>, vector<2x128xf32> -> vector<2x128xf32>
    %7 = vector.broadcast %4 : vector<1x128xf32> to vector<2x128xf32>
    %8 = arith.addf %6, %7 : vector<2x128xf32>
    %c0_6 = arith.constant 0 : index
    %c0_7 = arith.constant 0 : index
    %9 = vector.load %arg9[%c0_6, %c0_7] : memref<2x128xf32, #tpu.memory_space<vmem>>, vector<2x128xf32>
    tpu.vector_store %arg9[%c0_6, %c0_7], %8 {strides = array<i32>} : memref<2x128xf32, #tpu.memory_space<vmem>>, vector<2x128xf32>,
    return
  }
  func.func @transform_0(%arg0: i32, %arg1: i32) -> (i32, i32) {
    %c0_i32 = arith.constant 0 : i32
    %c0_i32_0 = arith.constant 0 : i32
    return %arg0, %c0_i32 : i32, i32
  }
  func.func @transform_1(%arg0: i32, %arg1: i32) -> (i32, i32) {
    %c0_i32 = arith.constant 0 : i32
    %c0_i32_0 = arith.constant 0 : i32
    %c0_i32_1 = arith.constant 0 : i32
    return %c0_i32, %c0_i32_0 : i32, i32
  }
  func.func @transform_2(%arg0: i32, %arg1: i32) -> (i32, i32) {
    %c0_i32 = arith.constant 0 : i32
    %c0_i32_0 = arith.constant 0 : i32
    %c0_i32_1 = arith.constant 0 : i32
    return %c0_i32, %c0_i32_0 : i32, i32
  }
  func.func @transform_3(%arg0: i32, %arg1: i32) -> (i32, i32) {
    %c0_i32 = arith.constant 0 : i32
    %c0_i32_0 = arith.constant 0 : i32
    %c0_i32_1 = arith.constant 0 : i32
    return %c0_i32, %c0_i32_0 : i32, i32
  }
  func.func @transform_4(%arg0: i32, %arg1: i32) -> (i32, i32) {
    %c0_i32 = arith.constant 0 : i32
    %c0_i32_0 = arith.constant 0 : i32
    %c0_i32_1 = arith.constant 0 : i32
    return %c0_i32, %c0_i32_0 : i32, i32
  }
  func.func @transform_5(%arg0: i32, %arg1: i32) -> (i32, i32) {
    %c0_i32 = arith.constant 0 : i32
    %c0_i32_0 = arith.constant 0 : i32
    return %c0_i32, %arg1 : i32, i32
  }
  func.func @transform_6(%arg0: i32, %arg1: i32) -> (i32, i32) {
    %c0_i32 = arith.constant 0 : i32
    %c0_i32_0 = arith.constant 0 : i32
    return %c0_i32, %arg1 : i32, i32
  }
  func.func @transform_7(%arg0: i32, %arg1: i32) -> (i32, i32) {
    %c0_i32 = arith.constant 0 : i32
    return %arg0, %arg1 : i32, i32
  }
}

</mosaic_0001>

<bundles_post_ra>
// kernel: tpu_custom_call.1
= control target key start
LH: loop header
LB: loop body
LE: loop exit
PB: predicated region body
PF: predicated region fallthrough
CT: control target
= control target key end

     0   :  { %s432_s0 = inlined_call_operand.vmem [shape: f32[2,256], index: 0, kind: input, shape index: {}]   ;;  %s433_s1 = inlined_call_operand.vmem [shape: f32[256,64], index: 1, kind: input, shape index: {}]   ;;  %s434_s2 = inlined_call_operand.vmem [shape: f32[1,64], index: 2, kind: input, shape index: {}]   ;;  %s435_s3 = inlined_call_operand.vmem [shape: f32[64,48], index: 3, kind: input, shape index: {}]   ;;  %s436_s4 = inlined_call_operand.vmem [shape: f32[1,48], index: 4, kind: input, shape index: {}]   ;;  %s437_s5 = inlined_call_operand.vmem [shape: f32[48,128], index: 5, kind: input, shape index: {}]   ;;  %s438_s6 = inlined_call_operand.vmem [shape: f32[1,128], index: 6, kind: input, shape index: {}]   ;;  %s439_s7 = inlined_call_operand.hbm [shape: f32[2,128], index: 7, kind: output, shape index: {}]  }
   0x1   :  { %v47_v0 = vld [vmem:[%s433_s1 + $0x78] sm:$0xff]  ;;  %v46_v1 = vld [vmem:[%s433_s1 + $0x70] sm:$0xff]  ;;  %v45_v4 = vld [vmem:[%s433_s1 + $0x68] sm:$0xff] }
   0x2   :  { %v63_v2 = vld [vmem:[%s433_s1 + $0xf8] sm:$0xff]  ;;  %74 = vmatpush.msra.mxu0 %v47_v0  ;;  %v62_v3 = vld [vmem:[%s433_s1 + $0xf0] sm:$0xff]  ;;  %v61_v5 = vld [vmem:[%s433_s1 + $0xe8] sm:$0xff] }
   0x3   :  { %94 = vmatpush.msra.mxu1 %v63_v2  ;;  %v44_v6 = vld [vmem:[%s433_s1 + $0x60] sm:$0xff]  ;;  %v43_v8 = vld [vmem:[%s433_s1 + $0x58] sm:$0xff]  ;;  %v42_v10 = vld [vmem:[%s433_s1 + $0x50] sm:$0xff] }
   0x4   :  { %75 = vmatpush.msra.mxu0 %v46_v1  ;;  %v60_v7 = vld [vmem:[%s433_s1 + $0xe0] sm:$0xff]  ;;  %v59_v9 = vld [vmem:[%s433_s1 + $0xd8] sm:$0xff]  ;;  %v58_v11 = vld [vmem:[%s433_s1 + $0xd0] sm:$0xff] }
   0x5   :  { %95 = vmatpush.msra.mxu1 %v62_v3  ;;  %v41_v12 = vld [vmem:[%s433_s1 + $0x48] sm:$0xff]  ;;  %v31_v14 = vld [vmem:[%s432_s0] sm:$0xf]  ;;  %v122_v16 = vld [vmem:[%s435_s3 + $0x38] sm:$0xff] }
   0x6   :  { %76 = vmatpush.msra.mxu0 %v45_v4  ;;  %v57_v13 = vld [vmem:[%s433_s1 + $0xc8] sm:$0xff]  ;;  %v40_v15 = vld [vmem:[%s433_s1 + $0x40] sm:$0xff]  ;;  %69 = vst [vmem:[#allocation1] ss:$4 sm:$0xff] %v31_v14  ;;  %v121_v17 = vld [vmem:[%s435_s3 + $0x30] sm:$0xff]  ;;  %139 = vmatpush.msra.mxu2 %v122_v16 }
   0x7   :  { %96 = vmatpush.msra.mxu1 %v61_v5  ;;  %v56_v18 = vld [vmem:[%s433_s1 + $0xc0] sm:$0xff]  ;;  %v120_v19 = vld [vmem:[%s435_s3 + $0x28] sm:$0xff] }
   0x8   :  { %77 = vmatpush.msra.mxu0 %v44_v6 }
   0x9   :  { %97 = vmatpush.msra.mxu1 %v60_v7 }
   0xa   :  { %78 = vmatpush.msra.mxu0 %v43_v8 }
   0xb   :  { %98 = vmatpush.msra.mxu1 %v59_v9 }
   0xc   :  { %79 = vmatpush.msra.mxu0 %v42_v10 }
   0xd   :  { %99 = vmatpush.msra.mxu1 %v58_v11 }
   0xe   :  { %80 = vmatpush.msra.mxu0 %v41_v12 }
   0xf   :  { %100 = vmatpush.msra.mxu1 %v57_v13 }
  0x10   :  { %12 = vsyncpa [#allocation4], 0  ;;  %v39_v20 = vld [vmem:[%s433_s1 + $0x38] sm:$0xff]  ;;  %140 = vmatpush.msra.mxu2 %v121_v17  ;;  %81 = vmatpush.msra.mxu0 %v40_v15  ;;  %v119_v22 = vld [vmem:[%s435_s3 + $0x20] sm:$0xff]  ;;  %vm127_vm0 = vcmask 523264   ;;  %vm152_vm1 = vcmask 386048  }
  0x11   :  { %v55_v21 = vld [vmem:[%s433_s1 + $0xb8] sm:$0xff]  ;;  %101 = vmatpush.msra.mxu1 %v56_v18  ;;  %v38_v23 = vld [vmem:[%s433_s1 + $0x30] sm:$0xff]  ;;  %v37_v25 = vld [vmem:[%s433_s1 + $0x28] sm:$0xff]  ;;  %vm165_vm2 = vcmask 392192   ;;  %s238_s26 = smov [#allocation3]   ;;  %s197_s29 = sshll.u32 %s439_s7, 4  ;;  %s198_s29 = int_to_ptr.hbm [resolvable:$true] %s197_s29 }
  0x12   :  { %v54_v24 = vld [vmem:[%s433_s1 + $0xb0] sm:$0xff]  ;;  %141 = vmatpush.msra.mxu2 %v120_v19  ;;  %82 = vmatpush.msra.mxu0 %v39_v20  ;;  %v53_v26 = vld [vmem:[%s433_s1 + $0xa8] sm:$0xff]  ;;  %v36_v27 = vld [vmem:[%s433_s1 + $0x20] sm:$0xff] }
  0x13   :  { %102 = vmatpush.msra.mxu1 %v55_v21  ;;  %v52_v28 = vld [vmem:[%s433_s1 + $0xa0] sm:$0xff]  ;;  %v35_v29 = vld [vmem:[%s433_s1 + $0x18] sm:$0xff]  ;;  %v34_v31 = vld [vmem:[%s433_s1 + $0x10] sm:$0xff] }
  0x14   :  { %142 = vmatpush.msra.mxu2 %v119_v22  ;;  %83 = vmatpush.msra.mxu0 %v38_v23  ;;  %v51_v30 = vld [vmem:[%s433_s1 + $0x98] sm:$0xff]  ;;  %v50_v32 = vld [vmem:[%s433_s1 + $0x90] sm:$0xff]  ;;  %v33_v33 = vld [vmem:[%s433_s1 + $0x8] sm:$0xff] }
  0x15   :  { %103 = vmatpush.msra.mxu1 %v54_v24  ;;  %v49_v34 = vld [vmem:[%s433_s1 + $0x88] sm:$0xff]  ;;  %v32_v35 = vld [vmem:[%s433_s1] sm:$0xff]  ;;  %v118_v39 = vld [vmem:[%s435_s3 + $0x18] sm:$0xff] }
  0x16   :  { %84 = vmatpush.msra.mxu0 %v37_v25  ;;  %v48_v36 = vld [vmem:[%s433_s1 + $0x80] sm:$0xff]  ;;  %v71_v38 = vld.sshfl [vmem:[#allocation1 + $0x8] sm:$0xff pattern:$0x73625140]  ;;  %143 = vmatpush.msra.mxu2 %v118_v39  ;;  %v117_v40 = vld [vmem:[%s435_s3 + $0x10] sm:$0xff] }
  0x17   :  { %104 = vmatpush.msra.mxu1 %v53_v26  ;;  %v70_v37 = vld.sshfl [vmem:[#allocation1] sm:$0xff pattern:$0x73625140]  ;;  %v116_v41 = vld [vmem:[%s435_s3 + $0x8] sm:$0xff]  ;;  %v157_v51 = vld [vmem:[%s437_s5 + $0x18] sm:$0xff] }
  0x18   :  { %85 = vmatpush.msra.mxu0 %v36_v27  ;;  %144 = vmatpush.msra.mxu2 %v117_v40  ;;  %v115_v42 = vld [vmem:[%s435_s3] sm:$0xff]  ;;  %v159_v49 = vld [vmem:[%s437_s5 + $0x28] sm:$0xff]  ;;  %v156_v52 = vld [vmem:[%s437_s5 + $0x10] sm:$0xff] }
  0x19   :  { %105 = vmatpush.msra.mxu1 %v52_v28  ;;  %v209_v43 = vld [vmem:[%s434_s2] ss:$0 sm:$0xff]  ;;  %179 = vmatpush.msra.mxu3 %v159_v49  ;;  %v155_v53 = vld [vmem:[%s437_s5 + $0x8] sm:$0xff] }
  0x1a   :  { %86 = vmatpush.msra.mxu0 %v35_v29  ;;  %145 = vmatpush.msra.mxu2 %v116_v41  ;;  %v158_v50 = vld [vmem:[%s437_s5 + $0x20] sm:$0xff] }
  0x1b   :  { %106 = vmatpush.msra.mxu1 %v51_v30  ;;  %180 = vmatpush.msra.mxu3 %v158_v50  ;;  %v154_v54 = vld [vmem:[%s437_s5] sm:$0xff]  ;;  %s195_s5 = sshll.u32 %s238_s26, 4  ;;  %s196_s5 = int_to_ptr.vmem [resolvable:$true] %s195_s5 }
  0x1c   :  { %87 = vmatpush.msra.mxu0 %v34_v31  ;;  %146 = vmatpush.msra.mxu2 %v115_v42  ;;  %v210_v55 = vld [vmem:[%s436_s4] ss:$0 sm:$0xff] }
  0x1d   :  { %107 = vmatpush.msra.mxu1 %v50_v32  ;;  %181 = vmatpush.msra.mxu3 %v157_v51  ;;  %v211_v60 = vld [vmem:[%s438_s6] ss:$0 sm:$0xff] }
  0x1e   :  { %88 = vmatpush.msra.mxu0 %v33_v33 }
  0x1f   :  { %108 = vmatpush.msra.mxu1 %v49_v34  ;;  %182 = vmatpush.msra.mxu3 %v156_v52 }
  0x20   :  { %89 = vmatpush.msra.mxu0 %v32_v35 }
  0x21   :  { %109 = vmatpush.msra.mxu1 %v48_v36  ;;  %90 = vmatmul.f32.vlgmr.msra.gmra.mxu0 %v70_v37 }
  0x22   :  { %110 = vmatmul.f32.vlgmr.msra.gmra.mxu1 %v71_v38  ;;  %183 = vmatpush.msra.mxu3 %v155_v53 }
  0x24   :  { %184 = vmatpush.msra.mxu3 %v154_v54 }
  0x9e   :  { %v91_v44 = vpop.f32.mrf.mxu0 }
  0x9f   :  { %v111_v45 = vpop.f32.mrf.mxu1  ;;  %v92_v46 = vadd.f32 %v209_v43, %v91_v44 }
  0xa1   :  { %v112_v47 = vadd.f32 %v111_v45, %v92_v46 }
  0xa3   :  { %v114_v48 = vmax.f32 %v112_v47, 0.0 }
  0xa5   :  { %206 = vmatmul.msk.f32.vlgmr.msra.gmra.mxu2 %vm127_vm0, %v114_v48 }
 0x128   :  { %v148_v56 = vpop.f32.mrf.mxu2 }
 0x129   :  { %v149_v57 = vadd.f32 %v210_v55, %v148_v56 }
 0x12b   :  { %v151_v58 = vmax.f32 %v149_v57, 0.0 }
 0x12d   :  { %153 = vst.msk [vmem:[#allocation2] sm:$0x3] %vm152_vm1, %v151_v58 }
 0x134   :  { %v161_v59 = vld [vmem:[#allocation2] sm:$0x3] }
 0x135   :  { %207 = vmatmul.msk.f32.vlgmr.msra.gmra.mxu3 %vm165_vm2, %v161_v59 }
 0x1b8   :  { %v186_v61 = vpop.f32.mrf.mxu3 }
 0x1b9   :  { %v187_v62 = vadd.f32 %v211_v60, %v186_v61 }
 0x1bb   :  { %189 = vst [vmem:[#allocation3] sm:$0x3] %v187_v62 }
 0x1bc   :  { %200 = dma.vmem_to_hbm [thread:$0]  %s196_s5, 32, %s198_s29, [#allocation4]  }
 0x1bd   :  { %236 = dma.done.wait [#allocation4], 32  }
 0x1be   :  { %237 = vsyncadd [#allocation4], 4294967264 }
 0x1bf   :  { %205 = vsyncpa [#allocation4], 1 }

</bundles_post_ra>
